<compile_context>
chip_gen: v7x
topology: tpu7x:2x2x1
jax: 0.10.0
libtpu: 0.0.40
codegen_flags: <defaults>
</compile_context>

<pallas_src>
import numpy as np
import jax
import jax.numpy as jnp
from jax.experimental import pallas as pl
from jax.experimental.pallas import tpu as pltpu


# --------------------------------------------------------------------------
# Host-side dense-operator construction (parameter setup glue, plain numpy)
# --------------------------------------------------------------------------
def conv1d_dense(w, b, Lin, stride):
    """Conv1d (PyTorch weight (Cout,Cin,K)) as dense (Cin*Lin, Cout*Lout) matrix."""
    Cout, Cin, K = w.shape
    Lout = (Lin - K) // stride + 1
    M = np.zeros((Cin * Lin, Cout * Lout), np.float32)
    for co in range(Cout):
        for ci in range(Cin):
            for t in range(Lout):
                for k in range(K):
                    M[ci * Lin + t * stride + k, co * Lout + t] += w[co, ci, k]
    bvec = np.repeat(np.asarray(b, np.float32), Lout)[None, :]
    return M, bvec, Lout


def convT1d_dense(w, b, Lin, stride):
    """ConvTranspose1d (PyTorch weight (Cin,Cout,K)) as dense matrix."""
    Cin, Cout, K = w.shape
    Lout = (Lin - 1) * stride + K
    M = np.zeros((Cin * Lin, Cout * Lout), np.float32)
    for ci in range(Cin):
        for co in range(Cout):
            for l in range(Lin):
                for k in range(K):
                    M[ci * Lin + l, co * Lout + l * stride + k] += w[ci, co, k]
    bvec = np.repeat(np.asarray(b, np.float32), Lout)[None, :]
    return M, bvec, Lout


def maxpool_selectors(C, Lin):
    """MaxPool1d(2) = elementwise max of two 0/1 column-selector matmuls."""
    Lout = Lin // 2
    Se = np.zeros((C * Lin, C * Lout), np.float32)
    So = np.zeros((C * Lin, C * Lout), np.float32)
    for c in range(C):
        for t in range(Lout):
            Se[c * Lin + 2 * t, c * Lout + t] = 1.0
            So[c * Lin + 2 * t + 1, c * Lout + t] = 1.0
    return Se, So


# --------------------------------------------------------------------------
# Pallas kernel: the whole forward pass (11 bf16 matmuls + f32 tanh/max/bias)
# --------------------------------------------------------------------------
def autoencoder_kernel(x_ref, w_ref, b_ref, out_ref):
    f32 = jnp.float32

    def affine(h, idx, din, dout):
        acc = jnp.dot(h.astype(jnp.bfloat16), w_ref[idx, :din, :dout],
                      preferred_element_type=f32)
        return acc + b_ref[idx, :, :dout]

    def conv_tanh_pool(h, idx_even, idx_odd, din, dout):
        # max commutes with monotonic tanh: tanh(conv) then pool ==
        # tanh(max(even-selected conv, odd-selected conv))
        hb = h.astype(jnp.bfloat16)
        ze = jnp.dot(hb, w_ref[idx_even, :din, :dout],
                     preferred_element_type=f32) + b_ref[idx_even, :, :dout]
        zo = jnp.dot(hb, w_ref[idx_odd, :din, :dout],
                     preferred_element_type=f32) + b_ref[idx_odd, :, :dout]
        return jnp.tanh(jnp.maximum(ze, zo))

    h = x_ref[...]                                    # (TB, 128) f32, cols 100..127 are 0
    # ---- encoder ----
    h = conv_tanh_pool(h, 0, 1, 128, 128)             # conv1(1->4,k7,s3) + tanh + pool2
    h = conv_tanh_pool(h, 2, 3, 128, 128)             # conv2(4->8,k5)    + tanh + pool2
    h = jnp.tanh(affine(h, 4, 128, 128))              # conv3(8->16,k3)   + tanh
    h = jnp.tanh(affine(h, 5, 128, 128))              # conv4(16->24,k3)  + tanh
    # ---- fc_e -> fc_d -> convT1 linear map, composed on host ----
    h = jnp.tanh(affine(h, 6, 128, 128))
    # ---- decoder ----
    h = jnp.tanh(affine(h, 7, 128, 128))              # convT2(16->8,k5)
    h = jnp.tanh(affine(h, 8, 128, 128))              # convT3(8->6,k6,s2)
    h = jnp.tanh(affine(h, 9, 128, 256))              # convT4(6->4,k8,s2)  -> 184 (pad 256)
    h = jnp.tanh(affine(h, 10, 256, 128))             # convT5(4->1,k10,s2) -> 100 (pad 128)
    out_ref[...] = h


def _round_up(n, m):
    return ((n + m - 1) // m) * m


def conv1d_autoencoder_forward(x, w_blob, b_blob, *, batch_tile=256):
    """x: (B, 1, 100) f32  ->  (B, 1, 100) f32."""
    B = x.shape[0]
    x2d = x.reshape(B, 100).astype(jnp.float32)

    TB = min(batch_tile, _round_up(B, 8))             # batch tile (multiple of 8)
    B_pad = _round_up(B, TB)
    x_pad = jnp.zeros((B_pad, 128), jnp.float32).at[:B, :100].set(x2d)

    out = pl.pallas_call(
        autoencoder_kernel,
        out_shape=jax.ShapeDtypeStruct((B_pad, 128), jnp.float32),
        grid=(B_pad // TB,),
        in_specs=[
            pl.BlockSpec((TB, 128), lambda i: (i, 0)),             # x: batch-tiled
            pl.BlockSpec(w_blob.shape, lambda i: (0, 0, 0)),       # weights: resident
            pl.BlockSpec(b_blob.shape, lambda i: (0, 0, 0)),       # biases:  resident
        ],
        out_specs=pl.BlockSpec((TB, 128), lambda i: (i, 0)),
        compiler_params=pltpu.CompilerParams(
            dimension_semantics=("parallel",)),
    )(x_pad, w_blob, b_blob)

    return out[:B, :100].reshape(B, 1, 100)


# --------------------------------------------------------------------------
# Deterministic parameter init + host-side operator fusion / packing
# --------------------------------------------------------------------------
def build_params(key):
    keys = iter(jax.random.split(key, 32))

    def u(shape, fan_in):
        bound = 1.0 / np.sqrt(fan_in)
        return np.asarray(
            jax.random.uniform(next(keys), shape, jnp.float32, -bound, bound))

    raw = {}
    # encoder Conv1d weights (Cout, Cin, K)
    raw['e1w'], raw['e1b'] = u((4, 1, 7), 1 * 7),  u((4,), 1 * 7)
    raw['e2w'], raw['e2b'] = u((8, 4, 5), 4 * 5),  u((8,), 4 * 5)
    raw['e3w'], raw['e3b'] = u((16, 8, 3), 8 * 3), u((16,), 8 * 3)
    raw['e4w'], raw['e4b'] = u((24, 16, 3), 16 * 3), u((24,), 16 * 3)
    # fc layers (PyTorch nn.Linear weight is (out, in))
    raw['few'], raw['feb'] = u((32, 48), 48), u((32,), 48)
    raw['fdw'], raw['fdb'] = u((48, 32), 32), u((48,), 32)
    # decoder ConvTranspose1d weights (Cin, Cout, K)
    raw['d1w'], raw['d1b'] = u((24, 16, 3), 16 * 3), u((16,), 16 * 3)
    raw['d2w'], raw['d2b'] = u((16, 8, 5), 8 * 5),   u((8,), 8 * 5)
    raw['d3w'], raw['d3b'] = u((8, 6, 6), 6 * 6),    u((6,), 6 * 6)
    raw['d4w'], raw['d4b'] = u((6, 4, 8), 4 * 8),    u((4,), 4 * 8)
    raw['d5w'], raw['d5b'] = u((4, 1, 10), 1 * 10),  u((1,), 1 * 10)

    # exact dense operators
    e1M, e1B, _ = conv1d_dense(raw['e1w'], raw['e1b'], 100, 3)   # 100 -> 32  (4 ch)
    p1e, p1o = maxpool_selectors(4, 32)                          # 32 -> 16
    e2M, e2B, _ = conv1d_dense(raw['e2w'], raw['e2b'], 16, 1)    # 16 -> 12  (8 ch)
    p2e, p2o = maxpool_selectors(8, 12)                          # 12 -> 6
    e3M, e3B, _ = conv1d_dense(raw['e3w'], raw['e3b'], 6, 1)     # 6 -> 4    (16 ch)
    e4M, e4B, _ = conv1d_dense(raw['e4w'], raw['e4b'], 4, 1)     # 4 -> 2    (24 ch)
    feM, feB = raw['few'].T.copy(), raw['feb'][None, :].copy()
    fdM, fdB = raw['fdw'].T.copy(), raw['fdb'][None, :].copy()
    d1M, d1B, _ = convT1d_dense(raw['d1w'], raw['d1b'], 2, 1)    # 2 -> 4    (16 ch)
    d2M, d2B, _ = convT1d_dense(raw['d2w'], raw['d2b'], 4, 1)    # 4 -> 8    (8 ch)
    d3M, d3B, _ = convT1d_dense(raw['d3w'], raw['d3b'], 8, 2)    # 8 -> 20   (6 ch)
    d4M, d4B, _ = convT1d_dense(raw['d4w'], raw['d4b'], 20, 2)   # 20 -> 46  (4 ch)
    d5M, d5B, _ = convT1d_dense(raw['d5w'], raw['d5b'], 46, 2)   # 46 -> 100 (1 ch)

    # Fold MaxPool1d(2) into the preceding conv (valid: tanh monotonic).
    W1e, W1o, b1e, b1o = e1M @ p1e, e1M @ p1o, e1B @ p1e, e1B @ p1o
    W2e, W2o, b2e, b2o = e2M @ p2e, e2M @ p2o, e2B @ p2e, e2B @ p2o
    # Compose fc_e -> fc_d -> convT1 (purely linear chain) into one affine op.
    Wmid = feM @ fdM @ d1M
    bmid = feB @ fdM @ d1M + fdB @ d1M + d1B

    mats = [W1e, W1o, W2e, W2o, e3M, e4M, Wmid, d2M, d3M, d4M, d5M]
    bias = [b1e, b1o, b2e, b2o, e3B, e4B, bmid, d2B, d3B, d4B, d5B]

    # Pack into lane-dense padded blobs (zero padding keeps padded columns at
    # exactly 0 through tanh/max, so downstream zero rows contribute nothing).
    w_blob = np.zeros((len(mats), 256, 256), np.float32)   # ~1.4 MiB as bf16
    b_blob = np.zeros((len(bias), 1, 256), np.float32)
    for i, (m, b) in enumerate(zip(mats, bias)):
        w_blob[i, :m.shape[0], :m.shape[1]] = m
        b_blob[i, :, :b.shape[1]] = b

    return jnp.asarray(w_blob, jnp.bfloat16), jnp.asarray(b_blob, jnp.float32), raw


# --------------------------------------------------------------------------
# Pure-numpy reference (direct PyTorch conv semantics) for a sanity check
# --------------------------------------------------------------------------
def ref_conv1d(x, w, b, stride):
    B, Cin, L = x.shape
    Cout, _, K = w.shape
    Lout = (L - K) // stride + 1
    y = np.zeros((B, Cout, Lout), np.float32)
    for t in range(Lout):
        seg = x[:, :, t * stride:t * stride + K]
        y[:, :, t] = np.einsum('bik,oik->bo', seg, w)
    return y + b[None, :, None]


def ref_convT1d(x, w, b, stride):
    B, Cin, L = x.shape
    _, Cout, K = w.shape
    Lout = (L - 1) * stride + K
    y = np.zeros((B, Cout, Lout), np.float32)
    for l in range(L):
        y[:, :, l * stride:l * stride + K] += np.einsum('bi,iok->bok', x[:, :, l], w)
    return y + b[None, :, None]


def ref_maxpool(x):
    B, C, L = x.shape
    return x.reshape(B, C, L // 2, 2).max(-1)


def reference_forward(x, raw):
    h = np.tanh(ref_conv1d(x, raw['e1w'], raw['e1b'], 3))
    h = ref_maxpool(h)
    h = np.tanh(ref_conv1d(h, raw['e2w'], raw['e2b'], 1))
    h = ref_maxpool(h)
    h = np.tanh(ref_conv1d(h, raw['e3w'], raw['e3b'], 1))
    h = np.tanh(ref_conv1d(h, raw['e4w'], raw['e4b'], 1))
    B = h.shape[0]
    m = h.reshape(B, 48)
    m = m @ raw['few'].T + raw['feb']
    m = m @ raw['fdw'].T + raw['fdb']
    h = m.reshape(B, 24, 2)
    h = np.tanh(ref_convT1d(h, raw['d1w'], raw['d1b'], 1))
    h = np.tanh(ref_convT1d(h, raw['d2w'], raw['d2b'], 1))
    h = np.tanh(ref_convT1d(h, raw['d3w'], raw['d3b'], 2))
    h = np.tanh(ref_convT1d(h, raw['d4w'], raw['d4b'], 2))
    h = np.tanh(ref_convT1d(h, raw['d5w'], raw['d5b'], 2))
    return h


if __name__ == "__main__":
    key = jax.random.PRNGKey(0)
    kx, kx2, kp = jax.random.split(key, 3)

    w_blob, b_blob, raw = build_params(kp)

    # ---- small-batch correctness check (bf16 matmuls, f32 accumulation) ----
    B = 4
    x = jax.random.normal(kx, (B, 1, 100), jnp.float32)
    y = jax.block_until_ready(conv1d_autoencoder_forward(x, w_blob, b_blob))
    assert y.shape == (B, 1, 100), y.shape
    y_ref = reference_forward(np.asarray(x, np.float32), raw)
    err = np.max(np.abs(np.asarray(y) - y_ref))
    assert np.allclose(np.asarray(y), y_ref, atol=5e-2, rtol=0.0), f"max abs err {err}"

    # ---- larger batch exercising the batch-tiled grid (192 rows / 3 tiles) ----
    B2 = 160
    x2 = jax.random.normal(kx2, (B2, 1, 100), jnp.float32)
    y2 = jax.block_until_ready(
        conv1d_autoencoder_forward(x2, w_blob, b_blob, batch_tile=64))
    assert y2.shape == (B2, 1, 100), y2.shape
    y2_ref = reference_forward(np.asarray(x2, np.float32), raw)
    err2 = np.max(np.abs(np.asarray(y2) - y2_ref))
    assert np.allclose(np.asarray(y2), y2_ref, atol=5e-2, rtol=0.0), f"max abs err {err2}"

    print("KERNEL_OK")
</pallas_src>

<mosaic_0001>
module attributes {stable_mosaic.version = 11 : i64} {
  func.func @autoencoder_kernel(%arg0: i32, %arg1: memref<8x128xf32, #tpu.memory_space<vmem>>, %arg2: memref<11x256x256xbf16, #tpu.memory_space<vmem>>, %arg3: memref<11x1x256xf32, #tpu.memory_space<vmem>>, %arg4: memref<8x128xf32, #tpu.memory_space<vmem>>) attributes {dimension_semantics = [#tpu.dimension_semantics<parallel>], iteration_bounds = array<i64: 1>, scalar_prefetch = 0 : i64, scratch_operands = 0 : i64, tpu.core_type = #tpu.core_type<tc>, window_params = [{transform_indices = @transform_0, window_bounds = array<i64: 8, 128>}, {pipeline_mode = #tpu.pipeline_mode<synchronous>, transform_indices = @transform_1, window_bounds = array<i64: 11, 256, 256>}, {pipeline_mode = #tpu.pipeline_mode<synchronous>, transform_indices = @transform_2, window_bounds = array<i64: 11, 1, 256>}, {transform_indices = @transform_3, window_bounds = array<i64: 8, 128>}]} {
    %c0 = arith.constant 0 : index
    %c0_0 = arith.constant 0 : index
    %0 = vector.load %arg1[%c0, %c0_0] : memref<8x128xf32, #tpu.memory_space<vmem>>, vector<8x128xf32>
    %1 = arith.truncf %0 : vector<8x128xf32> to vector<8x128xbf16>
    %c0_1 = arith.constant 0 : index
    %c0_2 = arith.constant 0 : index
    %c0_3 = arith.constant 0 : index
    %2 = vector.load %arg2[%c0_1, %c0_2, %c0_3] : memref<11x256x256xbf16, #tpu.memory_space<vmem>>, vector<1x128x128xbf16>
    %3 = vector.shape_cast %2 : vector<1x128x128xbf16> to vector<128x128xbf16>
    %cst = arith.constant dense<0.000000e+00> : vector<8x128xf32>
    %4 = tpu.matmul %1, %3, %cst {dimension_numbers = #tpu.dot_dimension_numbers<[1], [0], [0], [1], [0, 0, 1, 1], [], []>} : vector<8x128xbf16>, vector<128x128xbf16>, vector<8x128xf32> -> vector<8x128xf32>
    %c0_4 = arith.constant 0 : index
    %c0_5 = arith.constant 0 : index
    %c0_6 = arith.constant 0 : index
    %5 = vector.load %arg3[%c0_4, %c0_5, %c0_6] : memref<11x1x256xf32, #tpu.memory_space<vmem>>, vector<1x1x128xf32>
    %6 = vector.shape_cast %5 : vector<1x1x128xf32> to vector<1x128xf32>
    %7 = vector.broadcast %6 : vector<1x128xf32> to vector<8x128xf32>
    %8 = arith.addf %4, %7 : vector<8x128xf32>
    %c1 = arith.constant 1 : index
    %c0_7 = arith.constant 0 : index
    %c0_8 = arith.constant 0 : index
    %9 = vector.load %arg2[%c1, %c0_7, %c0_8] : memref<11x256x256xbf16, #tpu.memory_space<vmem>>, vector<1x128x128xbf16>
    %10 = vector.shape_cast %9 : vector<1x128x128xbf16> to vector<128x128xbf16>
    %cst_9 = arith.constant dense<0.000000e+00> : vector<8x128xf32>
    %11 = tpu.matmul %1, %10, %cst_9 {dimension_numbers = #tpu.dot_dimension_numbers<[1], [0], [0], [1], [0, 0, 1, 1], [], []>} : vector<8x128xbf16>, vector<128x128xbf16>, vector<8x128xf32> -> vector<8x128xf32>
    %c1_10 = arith.constant 1 : index
    %c0_11 = arith.constant 0 : index
    %c0_12 = arith.constant 0 : index
    %12 = vector.load %arg3[%c1_10, %c0_11, %c0_12] : memref<11x1x256xf32, #tpu.memory_space<vmem>>, vector<1x1x128xf32>
    %13 = vector.shape_cast %12 : vector<1x1x128xf32> to vector<1x128xf32>
    %14 = vector.broadcast %13 : vector<1x128xf32> to vector<8x128xf32>
    %15 = arith.addf %11, %14 : vector<8x128xf32>
    %16 = arith.maximumf %8, %15 : vector<8x128xf32>
    %17 = math.tanh %16 : vector<8x128xf32>
    %18 = arith.truncf %17 : vector<8x128xf32> to vector<8x128xbf16>
    %c2 = arith.constant 2 : index
    %c0_13 = arith.constant 0 : index
    %c0_14 = arith.constant 0 : index
    %19 = vector.load %arg2[%c2, %c0_13, %c0_14] : memref<11x256x256xbf16, #tpu.memory_space<vmem>>, vector<1x128x128xbf16>
    %20 = vector.shape_cast %19 : vector<1x128x128xbf16> to vector<128x128xbf16>
    %cst_15 = arith.constant dense<0.000000e+00> : vector<8x128xf32>
    %21 = tpu.matmul %18, %20, %cst_15 {dimension_numbers = #tpu.dot_dimension_numbers<[1], [0], [0], [1], [0, 0, 1, 1], [], []>} : vector<8x128xbf16>, vector<128x128xbf16>, vector<8x128xf32> -> vector<8x128xf32>
    %c2_16 = arith.constant 2 : index
    %c0_17 = arith.constant 0 : index
    %c0_18 = arith.constant 0 : index
    %22 = vector.load %arg3[%c2_16, %c0_17, %c0_18] : memref<11x1x256xf32, #tpu.memory_space<vmem>>, vector<1x1x128xf32>
    %23 = vector.shape_cast %22 : vector<1x1x128xf32> to vector<1x128xf32>
    %24 = vector.broadcast %23 : vector<1x128xf32> to vector<8x128xf32>
    %25 = arith.addf %21, %24 : vector<8x128xf32>
    %c3 = arith.constant 3 : index
    %c0_19 = arith.constant 0 : index
    %c0_20 = arith.constant 0 : index
    %26 = vector.load %arg2[%c3, %c0_19, %c0_20] : memref<11x256x256xbf16, #tpu.memory_space<vmem>>, vector<1x128x128xbf16>
    %27 = vector.shape_cast %26 : vector<1x128x128xbf16> to vector<128x128xbf16>
    %cst_21 = arith.constant dense<0.000000e+00> : vector<8x128xf32>
    %28 = tpu.matmul %18, %27, %cst_21 {dimension_numbers = #tpu.dot_dimension_numbers<[1], [0], [0], [1], [0, 0, 1, 1], [], []>} : vector<8x128xbf16>, vector<128x128xbf16>, vector<8x128xf32> -> vector<8x128xf32>
    %c3_22 = arith.constant 3 : index
    %c0_23 = arith.constant 0 : index
    %c0_24 = arith.constant 0 : index
    %29 = vector.load %arg3[%c3_22, %c0_23, %c0_24] : memref<11x1x256xf32, #tpu.memory_space<vmem>>, vector<1x1x128xf32>
    %30 = vector.shape_cast %29 : vector<1x1x128xf32> to vector<1x128xf32>
    %31 = vector.broadcast %30 : vector<1x128xf32> to vector<8x128xf32>
    %32 = arith.addf %28, %31 : vector<8x128xf32>
    %33 = arith.maximumf %25, %32 : vector<8x128xf32>
    %34 = math.tanh %33 : vector<8x128xf32>
    %35 = arith.truncf %34 : vector<8x128xf32> to vector<8x128xbf16>
    %c4 = arith.constant 4 : index
    %c0_25 = arith.constant 0 : index
    %c0_26 = arith.constant 0 : index
    %36 = vector.load %arg2[%c4, %c0_25, %c0_26] : memref<11x256x256xbf16, #tpu.memory_space<vmem>>, vector<1x128x128xbf16>
    %37 = vector.shape_cast %36 : vector<1x128x128xbf16> to vector<128x128xbf16>
    %cst_27 = arith.constant dense<0.000000e+00> : vector<8x128xf32>
    %38 = tpu.matmul %35, %37, %cst_27 {dimension_numbers = #tpu.dot_dimension_numbers<[1], [0], [0], [1], [0, 0, 1, 1], [], []>} : vector<8x128xbf16>, vector<128x128xbf16>, vector<8x128xf32> -> vector<8x128xf32>
    %c4_28 = arith.constant 4 : index
    %c0_29 = arith.constant 0 : index
    %c0_30 = arith.constant 0 : index
    %39 = vector.load %arg3[%c4_28, %c0_29, %c0_30] : memref<11x1x256xf32, #tpu.memory_space<vmem>>, vector<1x1x128xf32>
    %40 = vector.shape_cast %39 : vector<1x1x128xf32> to vector<1x128xf32>
    %41 = vector.broadcast %40 : vector<1x128xf32> to vector<8x128xf32>
    %42 = arith.addf %38, %41 : vector<8x128xf32>
    %43 = math.tanh %42 : vector<8x128xf32>
    %44 = arith.truncf %43 : vector<8x128xf32> to vector<8x128xbf16>
    %c5 = arith.constant 5 : index
    %c0_31 = arith.constant 0 : index
    %c0_32 = arith.constant 0 : index
    %45 = vector.load %arg2[%c5, %c0_31, %c0_32] : memref<11x256x256xbf16, #tpu.memory_space<vmem>>, vector<1x128x128xbf16>
    %46 = vector.shape_cast %45 : vector<1x128x128xbf16> to vector<128x128xbf16>
    %cst_33 = arith.constant dense<0.000000e+00> : vector<8x128xf32>
    %47 = tpu.matmul %44, %46, %cst_33 {dimension_numbers = #tpu.dot_dimension_numbers<[1], [0], [0], [1], [0, 0, 1, 1], [], []>} : vector<8x128xbf16>, vector<128x128xbf16>, vector<8x128xf32> -> vector<8x128xf32>
    %c5_34 = arith.constant 5 : index
    %c0_35 = arith.constant 0 : index
    %c0_36 = arith.constant 0 : index
    %48 = vector.load %arg3[%c5_34, %c0_35, %c0_36] : memref<11x1x256xf32, #tpu.memory_space<vmem>>, vector<1x1x128xf32>
    %49 = vector.shape_cast %48 : vector<1x1x128xf32> to vector<1x128xf32>
    %50 = vector.broadcast %49 : vector<1x128xf32> to vector<8x128xf32>
    %51 = arith.addf %47, %50 : vector<8x128xf32>
    %52 = math.tanh %51 : vector<8x128xf32>
    %53 = arith.truncf %52 : vector<8x128xf32> to vector<8x128xbf16>
    %c6 = arith.constant 6 : index
    %c0_37 = arith.constant 0 : index
    %c0_38 = arith.constant 0 : index
    %54 = vector.load %arg2[%c6, %c0_37, %c0_38] : memref<11x256x256xbf16, #tpu.memory_space<vmem>>, vector<1x128x128xbf16>
    %55 = vector.shape_cast %54 : vector<1x128x128xbf16> to vector<128x128xbf16>
    %cst_39 = arith.constant dense<0.000000e+00> : vector<8x128xf32>
    %56 = tpu.matmul %53, %55, %cst_39 {dimension_numbers = #tpu.dot_dimension_numbers<[1], [0], [0], [1], [0, 0, 1, 1], [], []>} : vector<8x128xbf16>, vector<128x128xbf16>, vector<8x128xf32> -> vector<8x128xf32>
    %c6_40 = arith.constant 6 : index
    %c0_41 = arith.constant 0 : index
    %c0_42 = arith.constant 0 : index
    %57 = vector.load %arg3[%c6_40, %c0_41, %c0_42] : memref<11x1x256xf32, #tpu.memory_space<vmem>>, vector<1x1x128xf32>
    %58 = vector.shape_cast %57 : vector<1x1x128xf32> to vector<1x128xf32>
    %59 = vector.broadcast %58 : vector<1x128xf32> to vector<8x128xf32>
    %60 = arith.addf %56, %59 : vector<8x128xf32>
    %61 = math.tanh %60 : vector<8x128xf32>
    %62 = arith.truncf %61 : vector<8x128xf32> to vector<8x128xbf16>
    %c7 = arith.constant 7 : index
    %c0_43 = arith.constant 0 : index
    %c0_44 = arith.constant 0 : index
    %63 = vector.load %arg2[%c7, %c0_43, %c0_44] : memref<11x256x256xbf16, #tpu.memory_space<vmem>>, vector<1x128x128xbf16>
    %64 = vector.shape_cast %63 : vector<1x128x128xbf16> to vector<128x128xbf16>
    %cst_45 = arith.constant dense<0.000000e+00> : vector<8x128xf32>
    %65 = tpu.matmul %62, %64, %cst_45 {dimension_numbers = #tpu.dot_dimension_numbers<[1], [0], [0], [1], [0, 0, 1, 1], [], []>} : vector<8x128xbf16>, vector<128x128xbf16>, vector<8x128xf32> -> vector<8x128xf32>
    %c7_46 = arith.constant 7 : index
    %c0_47 = arith.constant 0 : index
    %c0_48 = arith.constant 0 : index
    %66 = vector.load %arg3[%c7_46, %c0_47, %c0_48] : memref<11x1x256xf32, #tpu.memory_space<vmem>>, vector<1x1x128xf32>
    %67 = vector.shape_cast %66 : vector<1x1x128xf32> to vector<1x128xf32>
    %68 = vector.broadcast %67 : vector<1x128xf32> to vector<8x128xf32>
    %69 = arith.addf %65, %68 : vector<8x128xf32>
    %70 = math.tanh %69 : vector<8x128xf32>
    %71 = arith.truncf %70 : vector<8x128xf32> to vector<8x128xbf16>
    %c8 = arith.constant 8 : index
    %c0_49 = arith.constant 0 : index
    %c0_50 = arith.constant 0 : index
    %72 = vector.load %arg2[%c8, %c0_49, %c0_50] : memref<11x256x256xbf16, #tpu.memory_space<vmem>>, vector<1x128x128xbf16>
    %73 = vector.shape_cast %72 : vector<1x128x128xbf16> to vector<128x128xbf16>
    %cst_51 = arith.constant dense<0.000000e+00> : vector<8x128xf32>
    %74 = tpu.matmul %71, %73, %cst_51 {dimension_numbers = #tpu.dot_dimension_numbers<[1], [0], [0], [1], [0, 0, 1, 1], [], []>} : vector<8x128xbf16>, vector<128x128xbf16>, vector<8x128xf32> -> vector<8x128xf32>
    %c8_52 = arith.constant 8 : index
    %c0_53 = arith.constant 0 : index
    %c0_54 = arith.constant 0 : index
    %75 = vector.load %arg3[%c8_52, %c0_53, %c0_54] : memref<11x1x256xf32, #tpu.memory_space<vmem>>, vector<1x1x128xf32>
    %76 = vector.shape_cast %75 : vector<1x1x128xf32> to vector<1x128xf32>
    %77 = vector.broadcast %76 : vector<1x128xf32> to vector<8x128xf32>
    %78 = arith.addf %74, %77 : vector<8x128xf32>
    %79 = math.tanh %78 : vector<8x128xf32>
    %80 = arith.truncf %79 : vector<8x128xf32> to vector<8x128xbf16>
    %c9 = arith.constant 9 : index
    %c0_55 = arith.constant 0 : index
    %c0_56 = arith.constant 0 : index
    %81 = vector.load %arg2[%c9, %c0_55, %c0_56] : memref<11x256x256xbf16, #tpu.memory_space<vmem>>, vector<1x128x256xbf16>
    %82 = vector.shape_cast %81 : vector<1x128x256xbf16> to vector<128x256xbf16>
    %cst_57 = arith.constant dense<0.000000e+00> : vector<8x256xf32>
    %83 = tpu.matmul %80, %82, %cst_57 {dimension_numbers = #tpu.dot_dimension_numbers<[1], [0], [0], [1], [0, 0, 1, 1], [], []>} : vector<8x128xbf16>, vector<128x256xbf16>, vector<8x256xf32> -> vector<8x256xf32>
    %c9_58 = arith.constant 9 : index
    %c0_59 = arith.constant 0 : index
    %c0_60 = arith.constant 0 : index
    %84 = vector.load %arg3[%c9_58, %c0_59, %c0_60] : memref<11x1x256xf32, #tpu.memory_space<vmem>>, vector<1x1x256xf32>
    %85 = vector.shape_cast %84 : vector<1x1x256xf32> to vector<1x256xf32>
    %86 = vector.broadcast %85 : vector<1x256xf32> to vector<8x256xf32>
    %87 = arith.addf %83, %86 : vector<8x256xf32>
    %88 = math.tanh %87 : vector<8x256xf32>
    %89 = arith.truncf %88 : vector<8x256xf32> to vector<8x256xbf16>
    %c10 = arith.constant 10 : index
    %c0_61 = arith.constant 0 : index
    %c0_62 = arith.constant 0 : index
    %90 = vector.load %arg2[%c10, %c0_61, %c0_62] : memref<11x256x256xbf16, #tpu.memory_space<vmem>>, vector<1x256x128xbf16>
    %91 = vector.shape_cast %90 : vector<1x256x128xbf16> to vector<256x128xbf16>
    %cst_63 = arith.constant dense<0.000000e+00> : vector<8x128xf32>
    %92 = tpu.matmul %89, %91, %cst_63 {dimension_numbers = #tpu.dot_dimension_numbers<[1], [0], [0], [1], [0, 0, 1, 1], [], []>} : vector<8x256xbf16>, vector<256x128xbf16>, vector<8x128xf32> -> vector<8x128xf32>
    %c10_64 = arith.constant 10 : index
    %c0_65 = arith.constant 0 : index
    %c0_66 = arith.constant 0 : index
    %93 = vector.load %arg3[%c10_64, %c0_65, %c0_66] : memref<11x1x256xf32, #tpu.memory_space<vmem>>, vector<1x1x128xf32>
    %94 = vector.shape_cast %93 : vector<1x1x128xf32> to vector<1x128xf32>
    %95 = vector.broadcast %94 : vector<1x128xf32> to vector<8x128xf32>
    %96 = arith.addf %92, %95 : vector<8x128xf32>
    %97 = math.tanh %96 : vector<8x128xf32>
    %c0_67 = arith.constant 0 : index
    %c0_68 = arith.constant 0 : index
    %98 = vector.load %arg4[%c0_67, %c0_68] : memref<8x128xf32, #tpu.memory_space<vmem>>, vector<8x128xf32>
    tpu.vector_store %arg4[%c0_67, %c0_68], %97 {strides = array<i32>} : memref<8x128xf32, #tpu.memory_space<vmem>>, vector<8x128xf32>,
    return
  }
  func.func @transform_0(%arg0: i32) -> (i32, i32) {
    %c0_i32 = arith.constant 0 : i32
    %c0_i32_0 = arith.constant 0 : i32
    return %arg0, %c0_i32 : i32, i32
  }
  func.func @transform_1(%arg0: i32) -> (i32, i32, i32) {
    %c0_i32 = arith.constant 0 : i32
    %c0_i32_0 = arith.constant 0 : i32
    %c0_i32_1 = arith.constant 0 : i32
    %c0_i32_2 = arith.constant 0 : i32
    return %c0_i32, %c0_i32_0, %c0_i32_1 : i32, i32, i32
  }
  func.func @transform_2(%arg0: i32) -> (i32, i32, i32) {
    %c0_i32 = arith.constant 0 : i32
    %c0_i32_0 = arith.constant 0 : i32
    %c0_i32_1 = arith.constant 0 : i32
    %c0_i32_2 = arith.constant 0 : i32
    return %c0_i32, %c0_i32_0, %c0_i32_1 : i32, i32, i32
  }
  func.func @transform_3(%arg0: i32) -> (i32, i32) {
    %c0_i32 = arith.constant 0 : i32
    %c0_i32_0 = arith.constant 0 : i32
    return %arg0, %c0_i32 : i32, i32
  }
}

</mosaic_0001>

<bundles_post_ra>
// kernel: tpu_custom_call.1
= control target key start
LH: loop header
LB: loop body
LE: loop exit
PB: predicated region body
PF: predicated region fallthrough
CT: control target
= control target key end

     0   :  { %8 = vsyncpa [#allocation3], 0  ;;  %s2241_s0 = inlined_call_operand.hbm [shape: f32[8,128], index: 0, kind: input, shape index: {}]   ;;  %s2242_s1 = inlined_call_operand.hbm [shape: bf16[11,256,256], index: 1, kind: input, shape index: {}]   ;;  %s2243_s2 = inlined_call_operand.hbm [shape: f32[11,1,256], index: 2, kind: input, shape index: {}]   ;;  %s2244_s3 = inlined_call_operand.hbm [shape: f32[8,128], index: 3, kind: output, shape index: {}]  }
   0x1   :  { %9 = vsyncpa [#allocation6], 0 }
   0x2   :  { %10 = vsyncpa [#allocation4], 0  ;;  %s2072_s12 = smov [#allocation5]   ;;  %s1978_s16 = scalar_lea.hbm %s2242_s1, 45056 }
   0x3   :  { %s26_s13 = sshll.u32 %s2072_s12, 4  ;;  %p1979_p0 = scmp.ne.s32.totalorder %s2242_s1, %s1978_s16  ;;  %s27_s13 = int_to_ptr.vmem [resolvable:$true] %s26_s13 }
   0x4   :  { %p1982_p1 = scmp.lt.u32.totalorder %s1978_s16, %s2242_s1 }
   0x6   :  { %p1984_p2 = pnand %p1982_p1, %p1979_p0 }
   0x8   :  { %1987 = shalt.err (!%p1984_p2)
}
   0x9   :  { %s1988_s21 = scalar_lea.vmem %s27_s13, 45056  ;;  %p1993_p4 = scmp.lt.s32.totalorder %s27_s13, %s27_s13 }
   0xa   :  { %p1989_p3 = scmp.ne.s32.totalorder %s27_s13, %s1988_s21  ;;  %p1994_p5 = scmp.lt.s32.totalorder %s1988_s21, %s1988_s21 }
   0xc   :  { %p1995_p6 = por %p1994_p5, %p1993_p4 }
   0xe   :  { %p1996_p7 = pnand %p1995_p6, %p1989_p3 }
  0x10   :  { %1999 = shalt.err (!%p1996_p7)
}
  0x11   :  { %s2073_s22 = smov 128   ;;  %s2074_s23 = smov 8  }
  0x12   :  { %32 = dma.hbm_to_vmem [thread:$0]  %s2242_s1, 45056, %s27_s13, [#allocation6], %s2073_s22, %s2073_s22, %s2074_s23  }
  0x13   :  { %s2075_s26 = smov [#allocation2]   ;;  %s2076_s28 = smov [#allocation7]  }
  0x14   :  { %s17_s27 = sshll.u32 %s2075_s26, 4  ;;  %s38_s29 = sshll.u32 %s2076_s28, 4  ;;  %s18_s27 = int_to_ptr.vmem [resolvable:$true] %s17_s27  ;;  %s39_s29 = int_to_ptr.vmem [resolvable:$true] %s38_s29 }
  0x15   :  { %s2000_s5 = scalar_lea.hbm %s2241_s0, 128 }
  0x16   :  { %p2001_p8 = scmp.ne.s32.totalorder %s2241_s0, %s2000_s5  ;;  %p2004_p9 = scmp.lt.u32.totalorder %s2000_s5, %s2241_s0 }
  0x18   :  { %p2006_p10 = pnand %p2004_p9, %p2001_p8 }
  0x1a   :  { %2009 = shalt.err (!%p2006_p10)
}
  0x1b   :  { %s2010_s1 = scalar_lea.vmem %s18_s27, 128  ;;  %p2015_p12 = scmp.lt.s32.totalorder %s18_s27, %s18_s27 }
  0x1c   :  { %p2011_p11 = scmp.ne.s32.totalorder %s18_s27, %s2010_s1  ;;  %p2016_p13 = scmp.lt.s32.totalorder %s2010_s1, %s2010_s1 }
  0x1e   :  { %p2017_p0 = por %p2016_p13, %p2015_p12 }
  0x20   :  { %p2018_p1 = pnand %p2017_p0, %p2011_p11 }
  0x22   :  { %2021 = shalt.err (!%p2018_p1)
}
  0x23   :  { %20 = dma.hbm_to_vmem [thread:$0]  %s2241_s0, 128, %s18_s27, [#allocation3]  }
  0x24   :  { %s2022_s14 = scalar_lea.hbm %s2243_s2, 352 }
  0x25   :  { %p2023_p2 = scmp.ne.s32.totalorder %s2243_s2, %s2022_s14  ;;  %p2026_p3 = scmp.lt.u32.totalorder %s2022_s14, %s2243_s2 }
  0x27   :  { %p2028_p4 = pnand %p2026_p3, %p2023_p2 }
  0x29   :  { %2031 = shalt.err (!%p2028_p4)
}
  0x2a   :  { %s2032_s19 = scalar_lea.vmem %s39_s29, 352  ;;  %p2037_p6 = scmp.lt.s32.totalorder %s39_s29, %s39_s29 }
  0x2b   :  { %p2033_p5 = scmp.ne.s32.totalorder %s39_s29, %s2032_s19  ;;  %p2038_p7 = scmp.lt.s32.totalorder %s2032_s19, %s2032_s19 }
  0x2d   :  { %p2039_p8 = por %p2038_p7, %p2037_p6 }
  0x2f   :  { %p2040_p9 = pnand %p2039_p8, %p2033_p5 }
  0x31   :  { %2043 = shalt.err (!%p2040_p9)
}
  0x32   :  { %s2077_s0 = smov 32   ;;  %s2078_s20 = smov 2  }
  0x33   :  { %44 = dma.hbm_to_vmem [thread:$0]  %s2243_s2, 352, %s39_s29, [#allocation6], %s2077_s0, %s2077_s0, %s2078_s20  }
  0x34   :  { %2066 = dma.done.wait [#allocation3], 128  }
  0x35   :  { %2067 = vsyncadd [#allocation3], 4294967168 }
  0x36   :  { %2068 = dma.done.wait [#allocation6], 45408  }
  0x37   :  { %2069 = vsyncadd [#allocation6], 4294921888  ;;  %v2079_v0 = vmov 0.0   ;;  %vm2080_vm0 = vmmov 0   ;;  %v1846_v1 = vld [vmem:[#allocation5] ss:$8 sps:$4 sm:$0xff]  }
  0x38   :  { %1655 = vmatprep.subr.bf16.mxu0 %v2079_v0  ;;  %1675 = vmatprep.subr.bf16.mxu1 %v2079_v0  ;;  %v1847_v2 = vld [vmem:[#allocation5 + $0x100] ss:$8 sps:$4 sm:$0xff]   ;;  %v1848_v3 = vld [vmem:[#allocation5 + $0x10] ss:$8 sps:$4 sm:$0xff]   ;;  %v1456_v62 = vld [vmem:[#allocation7 + $0x4] ss:$0 sm:$0xff] }
  0x39   :  { %1671 = vmatprep.mubr.msk.bf16.mxu0 %vm2080_vm0, %v2079_v0  ;;  %1691 = vmatprep.mubr.msk.bf16.mxu1 %vm2080_vm0, %v2079_v0  ;;  %v1849_v4 = vld [vmem:[#allocation5 + $0x110] ss:$8 sps:$4 sm:$0xff]   ;;  %v1850_v5 = vld [vmem:[#allocation5 + $0x20] ss:$8 sps:$4 sm:$0xff]   ;;  %v1465_v63 = vld [vmem:[#allocation7 + $0x6] ss:$0 sm:$0xff] }
  0x3a   :  { %1656 = vmatpush3.bf16.msra.mxu0 %v1846_v1  ;;  %1676 = vmatpush3.bf16.msra.mxu1 %v1847_v2  ;;  %v1851_v6 = vld [vmem:[#allocation5 + $0x120] ss:$8 sps:$4 sm:$0xff]   ;;  %v1852_v7 = vld [vmem:[#allocation5 + $0x30] ss:$8 sps:$4 sm:$0xff]   ;;  %s2082_s2 = smov [#allocation8]  }
  0x3b   :  { %1657 = vmatprep.subr.bf16.mxu0 %v2079_v0  ;;  %1677 = vmatprep.subr.bf16.mxu1 %v2079_v0  ;;  %v1853_v8 = vld [vmem:[#allocation5 + $0x130] ss:$8 sps:$4 sm:$0xff]   ;;  %v1854_v9 = vld [vmem:[#allocation5 + $0x40] ss:$8 sps:$4 sm:$0xff]   ;;  %s1428_s23 = sshll.u32 %s2082_s2, 4  ;;  %s1429_s23 = int_to_ptr.vmem [resolvable:$true] %s1428_s23 }
  0x3c   :  { %v1855_v10 = vld [vmem:[#allocation5 + $0x140] ss:$8 sps:$4 sm:$0xff]   ;;  %v1856_v11 = vld [vmem:[#allocation5 + $0x50] ss:$8 sps:$4 sm:$0xff]   ;;  %s2044_s24 = scalar_lea.vmem %s1429_s23, 128  ;;  %p2049_p11 = scmp.lt.s32.totalorder %s1429_s23, %s1429_s23 }
  0x3d   :  { %v1857_v12 = vld [vmem:[#allocation5 + $0x150] ss:$8 sps:$4 sm:$0xff]   ;;  %v1858_v13 = vld [vmem:[#allocation5 + $0x60] ss:$8 sps:$4 sm:$0xff]   ;;  %p2045_p10 = scmp.ne.s32.totalorder %s1429_s23, %s2044_s24  ;;  %p2050_p12 = scmp.lt.s32.totalorder %s2044_s24, %s2044_s24 }
  0x3e   :  { %1658 = vmatpush3.bf16.msra.mxu0 %v1848_v3  ;;  %1678 = vmatpush3.bf16.msra.mxu1 %v1849_v4  ;;  %v1859_v14 = vld [vmem:[#allocation5 + $0x160] ss:$8 sps:$4 sm:$0xff]   ;;  %v1860_v15 = vld [vmem:[#allocation5 + $0x70] ss:$8 sps:$4 sm:$0xff]  }
  0x3f   :  { %1659 = vmatprep.subr.bf16.mxu0 %v2079_v0  ;;  %1679 = vmatprep.subr.bf16.mxu1 %v2079_v0  ;;  %v55_v16 = vld [vmem:[#allocation2] sm:$0xff]  ;;  %v1862_v18 = vld [vmem:[#allocation5 + $0x200] ss:$8 sps:$4 sm:$0xff]   ;;  %p2051_p13 = por %p2050_p12, %p2049_p11 }
  0x40   :  { %v1861_v17 = vld [vmem:[#allocation5 + $0x170] ss:$8 sps:$4 sm:$0xff]   ;;  %v56_v19 = vpack.c.bf16 %v55_v16, %v55_v16  ;;  %v1863_v20 = vld [vmem:[#allocation5 + $0x300] ss:$8 sps:$4 sm:$0xff]  }
  0x41   :  { %v1864_v21 = vld [vmem:[#allocation5 + $0x210] ss:$8 sps:$4 sm:$0xff]   ;;  %v1866_v23 = vld [vmem:[#allocation5 + $0x220] ss:$8 sps:$4 sm:$0xff]   ;;  %p2052_p0 = pnand %p2051_p13, %p2045_p10 }
  0x42   :  { %1660 = vmatpush3.bf16.msra.mxu0 %v1850_v5  ;;  %1680 = vmatpush3.bf16.msra.mxu1 %v1851_v6  ;;  %v1865_v22 = vld [vmem:[#allocation5 + $0x310] ss:$8 sps:$4 sm:$0xff]   ;;  %v1867_v24 = vld [vmem:[#allocation5 + $0x320] ss:$8 sps:$4 sm:$0xff]  }
  0x43   :  { %1661 = vmatprep.subr.bf16.mxu0 %v2079_v0  ;;  %1681 = vmatprep.subr.bf16.mxu1 %v2079_v0  ;;  %v1868_v25 = vld [vmem:[#allocation5 + $0x230] ss:$8 sps:$4 sm:$0xff]   ;;  %v1870_v27 = vld [vmem:[#allocation5 + $0x240] ss:$8 sps:$4 sm:$0xff]  }
  0x44   :  { %v1869_v26 = vld [vmem:[#allocation5 + $0x330] ss:$8 sps:$4 sm:$0xff]   ;;  %v1871_v28 = vld [vmem:[#allocation5 + $0x340] ss:$8 sps:$4 sm:$0xff]  }
  0x45   :  { %v1872_v29 = vld [vmem:[#allocation5 + $0x250] ss:$8 sps:$4 sm:$0xff]   ;;  %v1874_v31 = vld [vmem:[#allocation5 + $0x260] ss:$8 sps:$4 sm:$0xff]  }
  0x46   :  { %1662 = vmatpush3.bf16.msra.mxu0 %v1852_v7  ;;  %1682 = vmatpush3.bf16.msra.mxu1 %v1853_v8  ;;  %v1873_v30 = vld [vmem:[#allocation5 + $0x350] ss:$8 sps:$4 sm:$0xff]   ;;  %v1875_v32 = vld [vmem:[#allocation5 + $0x360] ss:$8 sps:$4 sm:$0xff]  }
  0x47   :  { %1663 = vmatprep.subr.bf16.mxu0 %v2079_v0  ;;  %1683 = vmatprep.subr.bf16.mxu1 %v2079_v0  ;;  %v1876_v33 = vld [vmem:[#allocation5 + $0x270] ss:$8 sps:$4 sm:$0xff]   ;;  %v1438_v35 = vld [vmem:[#allocation7] ss:$0 sm:$0xff]  ;;  %v1447_v36 = vld [vmem:[#allocation7 + $0x2] ss:$0 sm:$0xff] }
  0x48   :  { %v1877_v34 = vld [vmem:[#allocation5 + $0x370] ss:$8 sps:$4 sm:$0xff]   ;;  %v1878_v49 = vld [vmem:[#allocation5 + $0x400] ss:$8 sps:$4 sm:$0xff]  }
  0x49   :  { %v1879_v51 = vld [vmem:[#allocation5 + $0x410] ss:$8 sps:$4 sm:$0xff]   ;;  %v1880_v52 = vld [vmem:[#allocation5 + $0x420] ss:$8 sps:$4 sm:$0xff]  }
  0x4a   :  { %1664 = vmatpush3.bf16.msra.mxu0 %v1854_v9  ;;  %1684 = vmatpush3.bf16.msra.mxu1 %v1855_v10  ;;  %v1881_v53 = vld [vmem:[#allocation5 + $0x430] ss:$8 sps:$4 sm:$0xff]   ;;  %v1882_v54 = vld [vmem:[#allocation5 + $0x440] ss:$8 sps:$4 sm:$0xff]  }
  0x4b   :  { %1665 = vmatprep.subr.bf16.mxu0 %v2079_v0  ;;  %1685 = vmatprep.subr.bf16.mxu1 %v2079_v0  ;;  %v1883_v55 = vld [vmem:[#allocation5 + $0x450] ss:$8 sps:$4 sm:$0xff]   ;;  %v1884_v56 = vld [vmem:[#allocation5 + $0x460] ss:$8 sps:$4 sm:$0xff]  }
  0x4c   :  { %v1885_v57 = vld [vmem:[#allocation5 + $0x470] ss:$8 sps:$4 sm:$0xff]   ;;  %v1886_v58 = vld [vmem:[#allocation5 + $0x500] ss:$8 sps:$4 sm:$0xff]  }
  0x4d   :  { %v1887_v59 = vld [vmem:[#allocation5 + $0x510] ss:$8 sps:$4 sm:$0xff]   ;;  %v1888_v60 = vld [vmem:[#allocation5 + $0x520] ss:$8 sps:$4 sm:$0xff]  }
  0x4e   :  { %1666 = vmatpush3.bf16.msra.mxu0 %v1856_v11  ;;  %1686 = vmatpush3.bf16.msra.mxu1 %v1857_v12  ;;  %v1889_v61 = vld [vmem:[#allocation5 + $0x530] ss:$8 sps:$4 sm:$0xff]   ;;  %v1892_v16 = vld [vmem:[#allocation5 + $0x560] ss:$8 sps:$4 sm:$0xff]  }
  0x4f   :  { %1667 = vmatprep.subr.bf16.mxu0 %v2079_v0  ;;  %1687 = vmatprep.subr.bf16.mxu1 %v2079_v0 }
  0x52   :  { %1668 = vmatpush3.bf16.msra.mxu0 %v1858_v13  ;;  %1688 = vmatpush3.bf16.msra.mxu1 %v1859_v14  ;;  %v1890_v14 = vld [vmem:[#allocation5 + $0x540] ss:$8 sps:$4 sm:$0xff]  }
  0x53   :  { %1669 = vmatprep.subr.bf16.mxu0 %v2079_v0  ;;  %1689 = vmatprep.subr.bf16.mxu1 %v2079_v0 }
  0x56   :  { %1670 = vmatpush3.bf16.msra.mxu0 %v1860_v15  ;;  %1690 = vmatpush3.bf16.msra.mxu1 %v1861_v17  ;;  %v1891_v15 = vld [vmem:[#allocation5 + $0x550] ss:$8 sps:$4 sm:$0xff]  }
  0x57   :  { %1695 = vmatprep.subr.bf16.mxu0 %v2079_v0  ;;  %1715 = vmatprep.subr.bf16.mxu1 %v2079_v0  ;;  %v1893_v17 = vld [vmem:[#allocation5 + $0x570] ss:$8 sps:$4 sm:$0xff]  }
  0x59   :  { %1672 = vmatmul.mubr.bf16.vlgmr.msra.gmra.mrb[0].mxu0 %v56_v19  ;;  %1692 = vmatmul.mubr.bf16.vlgmr.msra.gmra.mrb[0].mxu1 %v56_v19  ;;  %v1895_v19 = vld [vmem:[#allocation5 + $0x610] ss:$8 sps:$4 sm:$0xff]  }
  0x5a   :  { %1696 = vmatpush3.bf16.msra.mxu0 %v1862_v18  ;;  %1716 = vmatpush3.bf16.msra.mxu1 %v1863_v20  ;;  %v1894_v18 = vld [vmem:[#allocation5 + $0x600] ss:$8 sps:$4 sm:$0xff]  }
  0x5b   :  { %1697 = vmatprep.subr.bf16.mxu0 %v2079_v0  ;;  %1717 = vmatprep.subr.bf16.mxu1 %v2079_v0  ;;  %v1896_v20 = vld [vmem:[#allocation5 + $0x620] ss:$8 sps:$4 sm:$0xff]  }
  0x5c   :  { %1711 = vmatprep.mubr.msk.bf16.mxu0 %vm2080_vm0, %v2079_v0  ;;  %1731 = vmatprep.mubr.msk.bf16.mxu1 %vm2080_vm0, %v2079_v0 }
  0x5e   :  { %1698 = vmatpush3.bf16.msra.mxu0 %v1864_v21  ;;  %1718 = vmatpush3.bf16.msra.mxu1 %v1865_v22  ;;  %v1897_v21 = vld [vmem:[#allocation5 + $0x630] ss:$8 sps:$4 sm:$0xff]   ;;  %v1474_v22 = vld [vmem:[#allocation7 + $0x8] ss:$0 sm:$0xff] }
  0x5f   :  { %1699 = vmatprep.subr.bf16.mxu0 %v2079_v0  ;;  %1719 = vmatprep.subr.bf16.mxu1 %v2079_v0 }
  0x62   :  { %1700 = vmatpush3.bf16.msra.mxu0 %v1866_v23  ;;  %1720 = vmatpush3.bf16.msra.mxu1 %v1867_v24 }
  0x63   :  { %1701 = vmatprep.subr.bf16.mxu0 %v2079_v0  ;;  %1721 = vmatprep.subr.bf16.mxu1 %v2079_v0 }
  0x66   :  { %1702 = vmatpush3.bf16.msra.mxu0 %v1868_v25  ;;  %1722 = vmatpush3.bf16.msra.mxu1 %v1869_v26 }
  0x67   :  { %1703 = vmatprep.subr.bf16.mxu0 %v2079_v0  ;;  %1723 = vmatprep.subr.bf16.mxu1 %v2079_v0 }
  0x6a   :  { %1704 = vmatpush3.bf16.msra.mxu0 %v1870_v27  ;;  %1724 = vmatpush3.bf16.msra.mxu1 %v1871_v28 }
  0x6b   :  { %1705 = vmatprep.subr.bf16.mxu0 %v2079_v0  ;;  %1725 = vmatprep.subr.bf16.mxu1 %v2079_v0 }
  0x6e   :  { %1706 = vmatpush3.bf16.msra.mxu0 %v1872_v29  ;;  %1726 = vmatpush3.bf16.msra.mxu1 %v1873_v30  ;;  %v1898_v30 = vld [vmem:[#allocation5 + $0x640] ss:$8 sps:$4 sm:$0xff]  }
  0x6f   :  { %1707 = vmatprep.subr.bf16.mxu0 %v2079_v0  ;;  %1727 = vmatprep.subr.bf16.mxu1 %v2079_v0 }
  0x72   :  { %1708 = vmatpush3.bf16.msra.mxu0 %v1874_v31  ;;  %1728 = vmatpush3.bf16.msra.mxu1 %v1875_v32  ;;  %v1899_v31 = vld [vmem:[#allocation5 + $0x650] ss:$8 sps:$4 sm:$0xff]   ;;  %v1900_v32 = vld [vmem:[#allocation5 + $0x660] ss:$8 sps:$4 sm:$0xff]  }
  0x73   :  { %1709 = vmatprep.subr.bf16.mxu0 %v2079_v0  ;;  %1729 = vmatprep.subr.bf16.mxu1 %v2079_v0 }
  0x76   :  { %1710 = vmatpush3.bf16.msra.mxu0 %v1876_v33  ;;  %1730 = vmatpush3.bf16.msra.mxu1 %v1877_v34  ;;  %v1901_v33 = vld [vmem:[#allocation5 + $0x670] ss:$8 sps:$4 sm:$0xff]   ;;  %v1902_v34 = vld [vmem:[#allocation5 + $0x700] ss:$8 sps:$4 sm:$0xff]  }
  0x77   :  { %1735 = vmatprep.subr.bf16.mxu0 %v2079_v0  ;;  %1755 = vmatprep.subr.bf16.mxu1 %v2079_v0 }
 0x12c   :  { %v162_v37 = vpop.f32.mrb[0].mxu0  ;;  %v275_v39 = vpop.f32.mrb[0].mxu1 }
 0x12d   :  { %v163_v38 = vadd.f32 %v1438_v35, %v162_v37  ;;  %v1673_v40 = vpop.f32.mrb[1].mxu0  ;;  %v276_v41 = vadd.f32 %v1447_v36, %v275_v39  ;;  %v1693_v42 = vpop.f32.mrb[1].mxu1  ;;  %v1903_v35 = vld [vmem:[#allocation5 + $0x710] ss:$8 sps:$4 sm:$0xff]   ;;  %v1904_v36 = vld [vmem:[#allocation5 + $0x720] ss:$8 sps:$4 sm:$0xff]  }
 0x12e   :  { %v165_v43 = vpop.f32.mrb[2].mxu0  ;;  %v278_v44 = vpop.f32.mrb[2].mxu1  ;;  %v1905_v37 = vld [vmem:[#allocation5 + $0x730] ss:$8 sps:$4 sm:$0xff]  }
 0x12f   :  { %v1674_v45 = vpop.f32.mrb[3].mxu0  ;;  %v281_v46 = vmax.f32 %v163_v38, %v276_v41  ;;  %v1694_v47 = vpop.f32.mrb[3].mxu1  ;;  %v1483_v38 = vld [vmem:[#allocation7 + $0xa] ss:$0 sm:$0xff] }
 0x130   :  { %v1907_v47 = vld [vmem:[#allocation5 + $0x750] ss:$8 sps:$4 sm:$0xff]  }
 0x131   :  { %1958 = vtanh.f32 %v281_v46  ;;  %v1906_v46 = vld [vmem:[#allocation5 + $0x740] ss:$8 sps:$4 sm:$0xff]  }
 0x13b   :  { %v1959_v48 = vpop.eup %1958 }
 0x13c   :  { %v283_v50 = vpack.c.bf16 %v1959_v48, %v1959_v48  ;;  %v1908_v48 = vld [vmem:[#allocation5 + $0x760] ss:$8 sps:$4 sm:$0xff]  }
 0x13e   :  { %1712 = vmatmul.mubr.bf16.vlgmr.msra.gmra.mrb[4].mxu0 %v283_v50  ;;  %1732 = vmatmul.mubr.bf16.vlgmr.msra.gmra.mrb[4].mxu1 %v283_v50  ;;  %v1910_v50 = vld [vmem:[#allocation5 + $0x800] ss:$8 sps:$4 sm:$0xff]  }
 0x13f   :  { %1736 = vmatpush3.bf16.msra.mxu0 %v1878_v49  ;;  %1751 = vmatprep.mubr.msk.bf16.mxu0 %vm2080_vm0, %v2079_v0  ;;  %v1909_v49 = vld [vmem:[#allocation5 + $0x770] ss:$8 sps:$4 sm:$0xff]  }
 0x140   :  { %1737 = vmatprep.subr.bf16.mxu0 %v2079_v0  ;;  %1771 = vmatprep.mubr.msk.bf16.mxu1 %vm2080_vm0, %v2079_v0 }
 0x141   :  { %1756 = vmatpush3.bf16.msra.mxu1 %v1886_v58 }
 0x142   :  { %1757 = vmatprep.subr.bf16.mxu1 %v2079_v0 }
 0x143   :  { %1738 = vmatpush3.bf16.msra.mxu0 %v1879_v51  ;;  %v1911_v51 = vld [vmem:[#allocation5 + $0x810] ss:$8 sps:$4 sm:$0xff]  }
 0x144   :  { %1739 = vmatprep.subr.bf16.mxu0 %v2079_v0 }
 0x145   :  { %1758 = vmatpush3.bf16.msra.mxu1 %v1887_v59 }
 0x146   :  { %1759 = vmatprep.subr.bf16.mxu1 %v2079_v0 }
 0x147   :  { %1740 = vmatpush3.bf16.msra.mxu0 %v1880_v52  ;;  %v1912_v52 = vld [vmem:[#allocation5 + $0x820] ss:$8 sps:$4 sm:$0xff]  }
 0x148   :  { %1741 = vmatprep.subr.bf16.mxu0 %v2079_v0 }
 0x149   :  { %1760 = vmatpush3.bf16.msra.mxu1 %v1888_v60 }
 0x14a   :  { %1761 = vmatprep.subr.bf16.mxu1 %v2079_v0 }
 0x14b   :  { %1742 = vmatpush3.bf16.msra.mxu0 %v1881_v53  ;;  %v1913_v53 = vld [vmem:[#allocation5 + $0x830] ss:$8 sps:$4 sm:$0xff]  }
 0x14c   :  { %1743 = vmatprep.subr.bf16.mxu0 %v2079_v0 }
 0x14d   :  { %1762 = vmatpush3.bf16.msra.mxu1 %v1889_v61 }
 0x14e   :  { %1763 = vmatprep.subr.bf16.mxu1 %v2079_v0 }
 0x14f   :  { %1744 = vmatpush3.bf16.msra.mxu0 %v1882_v54  ;;  %v1492_v54 = vld [vmem:[#allocation7 + $0xc] ss:$0 sm:$0xff] }
 0x150   :  { %1745 = vmatprep.subr.bf16.mxu0 %v2079_v0 }
 0x151   :  { %1764 = vmatpush3.bf16.msra.mxu1 %v1890_v14 }
 0x152   :  { %1765 = vmatprep.subr.bf16.mxu1 %v2079_v0 }
 0x153   :  { %1746 = vmatpush3.bf16.msra.mxu0 %v1883_v55 }
 0x154   :  { %1747 = vmatprep.subr.bf16.mxu0 %v2079_v0 }
 0x155   :  { %1766 = vmatpush3.bf16.msra.mxu1 %v1891_v15 }
 0x156   :  { %1767 = vmatprep.subr.bf16.mxu1 %v2079_v0 }
 0x157   :  { %1748 = vmatpush3.bf16.msra.mxu0 %v1884_v56 }
 0x158   :  { %1749 = vmatprep.subr.bf16.mxu0 %v2079_v0 }
 0x159   :  { %1768 = vmatpush3.bf16.msra.mxu1 %v1892_v16 }
 0x15a   :  { %1769 = vmatprep.subr.bf16.mxu1 %v2079_v0 }
 0x15b   :  { %1750 = vmatpush3.bf16.msra.mxu0 %v1885_v57 }
 0x15c   :  { %1775 = vmatprep.subr.bf16.mxu0 %v2079_v0 }
 0x15d   :  { %1770 = vmatpush3.bf16.msra.mxu1 %v1893_v17 }
 0x15e   :  { %1795 = vmatprep.subr.bf16.mxu1 %v2079_v0 }
 0x211   :  { %v391_v1 = vpop.f32.mrb[4].mxu0  ;;  %v504_v2 = vpop.f32.mrb[4].mxu1 }
 0x212   :  { %v392_v3 = vadd.f32 %v1456_v62, %v391_v1  ;;  %v505_v4 = vadd.f32 %v1465_v63, %v504_v2  ;;  %v1713_v5 = vpop.f32.mrb[5].mxu0  ;;  %v1733_v6 = vpop.f32.mrb[5].mxu1  ;;  %v1914_v62 = vld [vmem:[#allocation5 + $0x840] ss:$8 sps:$4 sm:$0xff]   ;;  %v1915_v63 = vld [vmem:[#allocation5 + $0x850] ss:$8 sps:$4 sm:$0xff]  }
 0x213   :  { %v394_v7 = vpop.f32.mrb[6].mxu0  ;;  %v507_v8 = vpop.f32.mrb[6].mxu1  ;;  %v1916_v1 = vld [vmem:[#allocation5 + $0x860] ss:$8 sps:$4 sm:$0xff]   ;;  %v1917_v2 = vld [vmem:[#allocation5 + $0x870] ss:$8 sps:$4 sm:$0xff]  }
 0x214   :  { %v510_v9 = vmax.f32 %v392_v3, %v505_v4  ;;  %v1714_v10 = vpop.f32.mrb[7].mxu0  ;;  %v1734_v11 = vpop.f32.mrb[7].mxu1  ;;  %v1918_v3 = vld [vmem:[#allocation5 + $0x900] ss:$8 sps:$4 sm:$0xff]   ;;  %v1920_v4 = vld [vmem:[#allocation5 + $0x904] ss:$8 sps:$4 sm:$0xff]  }
 0x215   :  { %v1923_v5 = vld [vmem:[#allocation5 + $0x914] ss:$8 sps:$4 sm:$0xff]   ;;  %v1921_v6 = vld [vmem:[#allocation5 + $0x910] ss:$8 sps:$4 sm:$0xff]   ;;  %v1926_v7 = vld [vmem:[#allocation5 + $0x924] ss:$8 sps:$4 sm:$0xff]  }
 0x216   :  { %1960 = vtanh.f32 %v510_v9  ;;  %v1924_v8 = vld [vmem:[#allocation5 + $0x920] ss:$8 sps:$4 sm:$0xff]   ;;  %v1929_v9 = vld [vmem:[#allocation5 + $0x934] ss:$8 sps:$4 sm:$0xff]   ;;  %v1927_v10 = vld [vmem:[#allocation5 + $0x930] ss:$8 sps:$4 sm:$0xff]  }
 0x217   :  { %v1501_v11 = vld [vmem:[#allocation7 + $0xe] ss:$0 sm:$0xff] }
 0x220   :  { %v1961_v12 = vpop.eup %1960 }
 0x221   :  { %v512_v13 = vpack.c.bf16 %v1961_v12, %v1961_v12 }
 0x223   :  { %1752 = vmatmul.mubr.bf16.vlgmr.msra.gmra.mrb[8].mxu0 %v512_v13 }
 0x224   :  { %1791 = vmatprep.mubr.msk.bf16.mxu0 %vm2080_vm0, %v2079_v0  ;;  %1776 = vmatpush3.bf16.msra.mxu0 %v1894_v18  ;;  %v1932_v18 = vld [vmem:[#allocation5 + $0x944] ss:$8 sps:$4 sm:$0xff]  }
 0x225   :  { %1777 = vmatprep.subr.bf16.mxu0 %v2079_v0 }
 0x228   :  { %1778 = vmatpush3.bf16.msra.mxu0 %v1895_v19  ;;  %v1930_v19 = vld [vmem:[#allocation5 + $0x940] ss:$8 sps:$4 sm:$0xff]  }
 0x229   :  { %1779 = vmatprep.subr.bf16.mxu0 %v2079_v0 }
 0x22c   :  { %1780 = vmatpush3.bf16.msra.mxu0 %v1896_v20  ;;  %v1935_v20 = vld [vmem:[#allocation5 + $0x954] ss:$8 sps:$4 sm:$0xff]  }
 0x22d   :  { %1781 = vmatprep.subr.bf16.mxu0 %v2079_v0 }
 0x230   :  { %1782 = vmatpush3.bf16.msra.mxu0 %v1897_v21  ;;  %v1933_v21 = vld [vmem:[#allocation5 + $0x950] ss:$8 sps:$4 sm:$0xff]  }
 0x231   :  { %1783 = vmatprep.subr.bf16.mxu0 %v2079_v0 }
 0x234   :  { %1784 = vmatpush3.bf16.msra.mxu0 %v1898_v30  ;;  %v1945_v30 = vld [vmem:[#allocation5 + $0xa10] ss:$8 sps:$4 sm:$0xff]  }
 0x235   :  { %1785 = vmatprep.subr.bf16.mxu0 %v2079_v0 }
 0x238   :  { %1786 = vmatpush3.bf16.msra.mxu0 %v1899_v31  ;;  %v1946_v31 = vld [vmem:[#allocation5 + $0xaa0] ss:$8 sps:$4 sm:$0xff]  }
 0x239   :  { %1787 = vmatprep.subr.bf16.mxu0 %v2079_v0 }
 0x23c   :  { %1788 = vmatpush3.bf16.msra.mxu0 %v1900_v32  ;;  %v1947_v32 = vld [vmem:[#allocation5 + $0xa20] ss:$8 sps:$4 sm:$0xff]  }
 0x23d   :  { %1789 = vmatprep.subr.bf16.mxu0 %v2079_v0 }
 0x240   :  { %1790 = vmatpush3.bf16.msra.mxu0 %v1901_v33  ;;  %v1948_v33 = vld [vmem:[#allocation5 + $0xab0] ss:$8 sps:$4 sm:$0xff]  }
 0x241   :  { %1815 = vmatprep.subr.bf16.mxu0 %v2079_v0 }
 0x2f6   :  { %v620_v23 = vpop.f32.mrb[8].mxu0 }
 0x2f7   :  { %v621_v24 = vadd.f32 %v1474_v22, %v620_v23  ;;  %v1753_v25 = vpop.f32.mrb[9].mxu0  ;;  %v1938_v22 = vld [vmem:[#allocation5 + $0x964] ss:$8 sps:$4 sm:$0xff]   ;;  %v1936_v23 = vld [vmem:[#allocation5 + $0x960] ss:$8 sps:$4 sm:$0xff]  }
 0x2f8   :  { %v623_v26 = vpop.f32.mrb[10].mxu0  ;;  %v1939_v25 = vld [vmem:[#allocation5 + $0x970] ss:$8 sps:$4 sm:$0xff]  }
 0x2f9   :  { %1962 = vtanh.f32 %v621_v24  ;;  %v1754_v27 = vpop.f32.mrb[11].mxu0  ;;  %v1941_v24 = vld [vmem:[#allocation5 + $0x974] ss:$8 sps:$4 sm:$0xff]   ;;  %v2081_v26 = vmov 0  }
 0x2fa   :  { %v1942_v27 = vld [vmem:[#allocation5 + $0xa80] ss:$8 sps:$4 sm:$0xff]  }
 0x303   :  { %v1963_v28 = vpop.eup %1962 }
 0x304   :  { %v627_v29 = vpack.c.bf16 %v1963_v28, %v1963_v28  ;;  %v1943_v28 = vld [vmem:[#allocation5 + $0xa00] ss:$8 sps:$4 sm:$0xff]  }
 0x306   :  { %1772 = vmatmul.mubr.bf16.vlgmr.msra.gmra.mrb[8].mxu1 %v627_v29  ;;  %v1944_v29 = vld [vmem:[#allocation5 + $0xa90] ss:$8 sps:$4 sm:$0xff]  }
 0x307   :  { %1811 = vmatprep.mubr.msk.bf16.mxu1 %vm2080_vm0, %v2079_v0  ;;  %1796 = vmatpush3.bf16.msra.mxu1 %v1902_v34  ;;  %v1949_v34 = vld [vmem:[#allocation5 + $0xa30] ss:$8 sps:$4 sm:$0xff]  }
 0x308   :  { %1797 = vmatprep.subr.bf16.mxu1 %v2079_v0 }
 0x30b   :  { %1798 = vmatpush3.bf16.msra.mxu1 %v1903_v35  ;;  %v1510_v35 = vld [vmem:[#allocation7 + $0x10] ss:$0 sm:$0xff] }
 0x30c   :  { %1799 = vmatprep.subr.bf16.mxu1 %v2079_v0 }
 0x30f   :  { %1800 = vmatpush3.bf16.msra.mxu1 %v1904_v36 }
 0x310   :  { %1801 = vmatprep.subr.bf16.mxu1 %v2079_v0 }
 0x313   :  { %1802 = vmatpush3.bf16.msra.mxu1 %v1905_v37 }
 0x314   :  { %1803 = vmatprep.subr.bf16.mxu1 %v2079_v0 }
 0x317   :  { %1804 = vmatpush3.bf16.msra.mxu1 %v1906_v46  ;;  %v1953_v46 = vld [vmem:[#allocation5 + $0xa50] ss:$8 sps:$4 sm:$0xff]  }
 0x318   :  { %1805 = vmatprep.subr.bf16.mxu1 %v2079_v0 }
 0x31b   :  { %1806 = vmatpush3.bf16.msra.mxu1 %v1907_v47  ;;  %v1954_v47 = vld [vmem:[#allocation5 + $0xae0] ss:$8 sps:$4 sm:$0xff]  }
 0x31c   :  { %1807 = vmatprep.subr.bf16.mxu1 %v2079_v0 }
 0x31f   :  { %1808 = vmatpush3.bf16.msra.mxu1 %v1908_v48  ;;  %v1955_v48 = vld [vmem:[#allocation5 + $0xa60] ss:$8 sps:$4 sm:$0xff]  }
 0x320   :  { %1809 = vmatprep.subr.bf16.mxu1 %v2079_v0 }
 0x323   :  { %1810 = vmatpush3.bf16.msra.mxu1 %v1909_v49  ;;  %v1956_v49 = vld [vmem:[#allocation5 + $0xaf0] ss:$8 sps:$4 sm:$0xff]  }
 0x324   :  { %1198 = vmatprep.subr.bf16.mxu1 %v1920_v4 }
 0x3d9   :  { %v735_v39 = vpop.f32.mrb[8].mxu1 }
 0x3da   :  { %v736_v40 = vadd.f32 %v1483_v38, %v735_v39  ;;  %v1773_v41 = vpop.f32.mrb[9].mxu1 }
 0x3db   :  { %v738_v42 = vpop.f32.mrb[10].mxu1 }
 0x3dc   :  { %1964 = vtanh.f32 %v736_v40  ;;  %v1774_v43 = vpop.f32.mrb[11].mxu1 }
 0x3dd   :  { %v1950_v43 = vld [vmem:[#allocation5 + $0xac0] ss:$8 sps:$4 sm:$0xff]  }
 0x3e6   :  { %v1965_v44 = vpop.eup %1964 }
 0x3e7   :  { %v742_v45 = vpack.c.bf16 %v1965_v44, %v1965_v44  ;;  %v1951_v44 = vld [vmem:[#allocation5 + $0xa40] ss:$8 sps:$4 sm:$0xff]  }
 0x3e9   :  { %1792 = vmatmul.mubr.bf16.vlgmr.msra.gmra.mrb[12].mxu0 %v742_v45  ;;  %v1952_v45 = vld [vmem:[#allocation5 + $0xad0] ss:$8 sps:$4 sm:$0xff]  }
 0x3ea   :  { %1831 = vmatprep.mubr.msk.bf16.mxu0 %vm2080_vm0, %v2079_v0  ;;  %1816 = vmatpush3.bf16.msra.mxu0 %v1910_v50  ;;  %v1957_v50 = vld [vmem:[#allocation5 + $0xa70] ss:$8 sps:$4 sm:$0xff]  }
 0x3eb   :  { %1817 = vmatprep.subr.bf16.mxu0 %v2079_v0 }
 0x3ee   :  { %1818 = vmatpush3.bf16.msra.mxu0 %v1911_v51  ;;  %v1108_v51 = vlaneseq }
 0x3ef   :  { %1819 = vmatprep.subr.bf16.mxu0 %v2079_v0 }
 0x3f2   :  { %1820 = vmatpush3.bf16.msra.mxu0 %v1912_v52  ;;  %v1109_v52 = vshrl.u32 %v1108_v51, 7 }
 0x3f3   :  { %1821 = vmatprep.subr.bf16.mxu0 %v2079_v0 }
 0x3f6   :  { %1822 = vmatpush3.bf16.msra.mxu0 %v1913_v53  ;;  %v1110_v53 = vsub.s32 0, %v1109_v52 }
 0x3f7   :  { %1823 = vmatprep.subr.bf16.mxu0 %v2079_v0 }
 0x3fa   :  { %1824 = vmatpush3.bf16.msra.mxu0 %v1914_v62 }
 0x3fb   :  { %1825 = vmatprep.subr.bf16.mxu0 %v2079_v0 }
 0x3fe   :  { %1826 = vmatpush3.bf16.msra.mxu0 %v1915_v63 }
 0x3ff   :  { %1827 = vmatprep.subr.bf16.mxu0 %v2079_v0 }
 0x402   :  { %1828 = vmatpush3.bf16.msra.mxu0 %v1916_v1 }
 0x403   :  { %1829 = vmatprep.subr.bf16.mxu0 %v2079_v0 }
 0x406   :  { %1830 = vmatpush3.bf16.msra.mxu0 %v1917_v2 }
 0x407   :  { %1633 = vmatprep.subr.bf16.mxu0 %v1942_v27 }
 0x4bc   :  { %v850_v55 = vpop.f32.mrb[12].mxu0 }
 0x4bd   :  { %v851_v56 = vadd.f32 %v1492_v54, %v850_v55  ;;  %v1793_v57 = vpop.f32.mrb[13].mxu0  ;;  %v1106_v54 = vld [vmem:[#allocation7 + $0x12] sm:$0x3]  ;;  %v1114_v55 = vsub.s32 1, %v1109_v52 }
 0x4be   :  { %v853_v58 = vpop.f32.mrb[14].mxu0 }
 0x4bf   :  { %1966 = vtanh.f32 %v851_v56  ;;  %v1794_v59 = vpop.f32.mrb[15].mxu0  ;;  %v1111_v56 = vrot.slane %v1106_v54, %v1110_v53  ;;  %v1115_v57 = vrot.slane %v1106_v54, %v1114_v55 }
 0x4c9   :  { %v1967_v60 = vpop.eup %1966 }
 0x4ca   :  { %v857_v61 = vpack.c.bf16 %v1967_v60, %v1967_v60 }
 0x4cc   :  { %1812 = vmatmul.mubr.bf16.vlgmr.msra.gmra.mrb[12].mxu1 %v857_v61 }
 0x4cd   :  { %1199 = vmatpush1.bf16.msra.mxu1 %v1918_v3  ;;  %1230 = vmatprep.mubr.bf16.mxu1 %v2081_v26 }
 0x4ce   :  { %1200 = vmatprep.subr.bf16.mxu1 %v1923_v5 }
 0x4d1   :  { %1201 = vmatpush1.bf16.msra.mxu1 %v1921_v6  ;;  %v1535_v6 = vld [vmem:[#allocation7 + $0x14] ss:$0 sm:$0xff] }
 0x4d2   :  { %1202 = vmatprep.subr.bf16.mxu1 %v1926_v7 }
 0x4d5   :  { %1203 = vmatpush1.bf16.msra.mxu1 %v1924_v8 }
 0x4d6   :  { %1204 = vmatprep.subr.bf16.mxu1 %v1929_v9 }
 0x4d9   :  { %1205 = vmatpush1.bf16.msra.mxu1 %v1927_v10 }
 0x4da   :  { %1206 = vmatprep.subr.bf16.mxu1 %v1932_v18 }
 0x4dd   :  { %1207 = vmatpush1.bf16.msra.mxu1 %v1930_v19 }
 0x4de   :  { %1208 = vmatprep.subr.bf16.mxu1 %v1935_v20 }
 0x4e1   :  { %1209 = vmatpush1.bf16.msra.mxu1 %v1933_v21 }
 0x4e2   :  { %1210 = vmatprep.subr.bf16.mxu1 %v1938_v22 }
 0x4e5   :  { %1211 = vmatpush1.bf16.msra.mxu1 %v1936_v23 }
 0x4e6   :  { %1212 = vmatprep.subr.bf16.mxu1 %v1941_v24 }
 0x4e9   :  { %1213 = vmatpush1.bf16.msra.mxu1 %v1939_v25 }
 0x59f   :  { %v965_v0 = vpop.f32.mrb[12].mxu1 }
 0x5a0   :  { %v966_v12 = vadd.f32 %v1501_v11, %v965_v0  ;;  %v1813_v13 = vpop.f32.mrb[13].mxu1 }
 0x5a1   :  { %v968_v14 = vpop.f32.mrb[14].mxu1 }
 0x5a2   :  { %1968 = vtanh.f32 %v966_v12  ;;  %v1814_v15 = vpop.f32.mrb[15].mxu1 }
 0x5ac   :  { %v1969_v16 = vpop.eup %1968 }
 0x5ad   :  { %v972_v17 = vpack.c.bf16 %v1969_v16, %v1969_v16 }
 0x5af   :  { %1832 = vmatmul.mubr.bf16.vlgmr.msra.gmra.mrb[16].mxu0 %v972_v17 }
 0x5b0   :  { %1634 = vmatpush3.bf16.msra.mxu0 %v1943_v28 }
 0x5b1   :  { %1635 = vmatprep.subr.bf16.mxu0 %v1944_v29 }
 0x5b4   :  { %1636 = vmatpush3.bf16.msra.mxu0 %v1945_v30 }
 0x5b5   :  { %1637 = vmatprep.subr.bf16.mxu0 %v1946_v31 }
 0x5b8   :  { %1638 = vmatpush3.bf16.msra.mxu0 %v1947_v32 }
 0x5b9   :  { %1639 = vmatprep.subr.bf16.mxu0 %v1948_v33 }
 0x5bc   :  { %1640 = vmatpush3.bf16.msra.mxu0 %v1949_v34 }
 0x5bd   :  { %1641 = vmatprep.subr.bf16.mxu0 %v1950_v43 }
 0x5c0   :  { %1642 = vmatpush3.bf16.msra.mxu0 %v1951_v44 }
 0x5c1   :  { %1643 = vmatprep.subr.bf16.mxu0 %v1952_v45 }
 0x5c4   :  { %1644 = vmatpush3.bf16.msra.mxu0 %v1953_v46 }
 0x5c5   :  { %1645 = vmatprep.subr.bf16.mxu0 %v1954_v47 }
 0x5c8   :  { %1646 = vmatpush3.bf16.msra.mxu0 %v1955_v48 }
 0x5c9   :  { %1647 = vmatprep.subr.bf16.mxu0 %v1956_v49 }
 0x5cc   :  { %1648 = vmatpush3.bf16.msra.mxu0 %v1957_v50 }
 0x682   :  { %v1080_v36 = vpop.f32.mrb[16].mxu0 }
 0x683   :  { %v1081_v37 = vadd.f32 %v1510_v35, %v1080_v36  ;;  %v1833_v38 = vpop.f32.mrb[17].mxu0 }
 0x684   :  { %v1083_v39 = vpop.f32.mrb[18].mxu0 }
 0x685   :  { %1970 = vtanh.f32 %v1081_v37  ;;  %v1834_v40 = vpop.f32.mrb[19].mxu0 }
 0x68f   :  { %v1971_v41 = vpop.eup %1970 }
 0x690   :  { %v1087_v42 = vpack.c.bf16 %v1971_v41, %v1971_v41 }
 0x692   :  { %1231 = vmatmul.mubr.bf16.vlgmr.msra.gmra.mrb[16].mxu1 %v1087_v42 }
 0x765   :  { %v1232_v58 = vpop.f32.mrb[16].mxu1 }
 0x766   :  { %v1233_v59 = vadd.f32 %v1232_v58, %v1111_v56  ;;  %v1234_v60 = vpop.f32.mrb[17].mxu1 }
 0x767   :  { %v1235_v61 = vadd.f32 %v1234_v60, %v1115_v57  ;;  %v1236_v62 = vpop.f32.mrb[18].mxu1 }
 0x768   :  { %1972 = vtanh.f32 %v1233_v59  ;;  %v1237_v63 = vpop.f32.mrb[19].mxu1 }
 0x769   :  { %1974 = vtanh.f32 %v1235_v61 }
 0x772   :  { %v1973_v1 = vpop.eup %1972 }
 0x773   :  { %v1975_v2 = vpop.eup %1974  ;;  %v1241_v4 = vpack.c.bf16 %v1973_v1, %v1973_v1 }
 0x774   :  { %v1242_v3 = vpack.c.bf16 %v1975_v2, %v1975_v2 }
 0x776   :  { %1412 = vmatprep.mubr.bf16.mxu0 %v1242_v3 }
 0x777   :  { %1413 = vmatmul.mubr.bf16.vlgmr.msra.gmra.mrb[20].mxu0 %v1241_v4 }
 0x84a   :  { %v1649_v5 = vpop.f32.mrb[20].mxu0 }
 0x84b   :  { %v1650_v7 = vpop.f32.mrb[21].mxu0 }
 0x84c   :  { %v1651_v8 = vadd.f32 %v1650_v7, %v1649_v5  ;;  %v1652_v9 = vpop.f32.mrb[22].mxu0 }
 0x84d   :  { %v1653_v10 = vpop.f32.mrb[23].mxu0 }
 0x84e   :  { %v1415_v11 = vadd.f32 %v1651_v8, %v1535_v6 }
 0x850   :  { %1976 = vtanh.f32 %v1415_v11 }
 0x85a   :  { %v1977_v0 = vpop.eup %1976 }
 0x85b   :  { %1421 = vst [vmem:[#allocation8] sm:$0xff] %v1977_v0 }
 0x85c   :  { %2055 = shalt.err (!%p2052_p0)
}
 0x85d   :  { %s2056_s27 = scalar_lea.hbm %s2244_s3, 128 }
 0x85e   :  { %p2057_p1 = scmp.ne.s32.totalorder %s2244_s3, %s2056_s27  ;;  %p2060_p2 = scmp.lt.u32.totalorder %s2056_s27, %s2244_s3 }
 0x860   :  { %p2062_p3 = pnand %p2060_p2, %p2057_p1 }
 0x862   :  { %2065 = shalt.err (!%p2062_p3)
}
 0x863   :  { %1431 = dma.vmem_to_hbm [thread:$0]  %s1429_s23, 128, %s2244_s3, [#allocation4]  }
 0x864   :  { %2070 = dma.done.wait [#allocation4], 128  }
 0x865   :  { %2071 = vsyncadd [#allocation4], 4294967168 }
 0x866   :  { %1435 = vsyncpa [#allocation3], 1 }
 0x867   :  { %1436 = vsyncpa [#allocation6], 1 }
 0x868   :  { %1437 = vsyncpa [#allocation4], 1 }

</bundles_post_ra>
